<compile_context>
chip_gen: v6e
topology: v6e:2x2x1
jax: 0.10.0
libtpu: 0.0.40
codegen_flags: <defaults>
</compile_context>

<pallas_src>
import functools

import jax
import jax.numpy as jnp
from jax.experimental import pallas as pl
from jax.experimental.pallas import tpu as pltpu


def _round_up(x, m):
    return ((x + m - 1) // m) * m


def _s2t_kernel(x_ref, w1_ref, b1_ref, wgm_ref, bgm_ref, wt_ref, bt_ref,
                out_ref, *, vg, td, vt):
    """Fused RecognitionNetwork + VLMapper + TranslationNetwork hot path.

    x_ref   : (1, tile_t+2, D_in) f32 time window with 1-frame halo each side
    w1_ref  : (3, D_in, H) bf16  temporal-conv taps
    b1_ref  : (1, H) f32
    wgm_ref : (H, W) bf16  [gloss classifier | VLMapper proj | zero pad]
    bgm_ref : (1, W) f32
    wt_ref  : (W, W) bf16  translation head, zero-padded so mapped lanes feed it
    bt_ref  : (1, W) f32
    out_ref : (tile_t, W) f32  [gloss log-probs | mapped | text log-probs | pad]
    """
    tt = out_ref.shape[0]
    w = out_ref.shape[1]

    x = x_ref[0]  # (tt+2, D_in) f32

    # Temporal conv (kernel=3, 'same' pad) as three shifted matmuls.
    # bf16 MXU operands, f32 accumulation.
    h = jnp.dot(x[0:tt, :].astype(jnp.bfloat16), w1_ref[0],
                preferred_element_type=jnp.float32)
    h = h + jnp.dot(x[1:tt + 1, :].astype(jnp.bfloat16), w1_ref[1],
                    preferred_element_type=jnp.float32)
    h = h + jnp.dot(x[2:tt + 2, :].astype(jnp.bfloat16), w1_ref[2],
                    preferred_element_type=jnp.float32)
    h = jnp.maximum(h + b1_ref[...], 0.0)                       # (tt, H) f32

    # Fused gloss-classifier + VLMapper matmul, N padded to full lane width W:
    # lanes [0,vg) = gloss logits, [vg,vg+td) = mapped feature, rest zeros.
    gm = jnp.dot(h.astype(jnp.bfloat16), wgm_ref[...],
                 preferred_element_type=jnp.float32) + bgm_ref[...]   # (tt, W)

    col = jax.lax.broadcasted_iota(jnp.int32, (tt, w), 1)

    # Gloss log-softmax restricted to gloss lanes (pad/mapped lanes -> -inf).
    g_mask = col < vg
    g_logits = jnp.where(g_mask, gm, -jnp.inf)
    g_max = jnp.max(g_logits, axis=-1, keepdims=True)
    g_lse = g_max + jnp.log(
        jnp.sum(jnp.exp(g_logits - g_max), axis=-1, keepdims=True))
    gm_ls = jnp.where(g_mask, gm - g_lse, gm)   # [gloss log-probs | mapped | 0]

    # Translation head: wt is zero-padded to (W, W) so only the mapped lanes
    # of gm contribute (gloss / pad lanes multiply zero rows).
    tl = jnp.dot(gm.astype(jnp.bfloat16), wt_ref[...],
                 preferred_element_type=jnp.float32) + bt_ref[...]    # (tt, W)
    t_lo = vg + td
    t_mask = (col >= t_lo) & (col < t_lo + vt)
    t_logits = jnp.where(t_mask, tl, -jnp.inf)
    t_max = jnp.max(t_logits, axis=-1, keepdims=True)
    t_lse = t_max + jnp.log(
        jnp.sum(jnp.exp(t_logits - t_max), axis=-1, keepdims=True))
    tl_ls = tl - t_lse

    # Single lane-dense output slab: [gloss_lp | mapped | txt_lp | pad].
    out_ref[...] = jnp.where(col < t_lo, gm_ls, tl_ls)


def sign_language_model_forward(src_input, params, *, tile_t=256):
    """S2T forward pass. Returns model_outputs dict."""
    x = src_input["sgn_features"]                             # (B, T, D_in) f32
    gloss_labels = src_input["gloss_labels"]                  # (B, T) int32
    txt_labels = src_input["translation_inputs"]["labels"]    # (B, T) int32

    B, T, D_in = x.shape
    w1 = params["w1"]                                         # (3*D_in, H)
    H = w1.shape[1]
    Vg = params["wg"].shape[1]
    Td = params["wm"].shape[1]
    Vt = params["wt"].shape[1]

    off_m, off_t = Vg, Vg + Td
    W = _round_up(Vg + Td + Vt, 128)          # lane-dense fused output width

    # --- time tiling: balanced chunks (<= tile_t), multiple of 8 sublanes.
    num_chunks = pl.cdiv(T, tile_t)
    tile_t = _round_up(pl.cdiv(T, num_chunks), 8)
    T_pad = tile_t * num_chunks

    # --- halo'd input windows (replaces the 3x host-side unfold; only the two
    #     halo frames per chunk are duplicated).
    x_halo = jnp.pad(x, ((0, 0), (1, 1 + T_pad - T), (0, 0)))
    win = jnp.stack(
        [x_halo[:, c * tile_t:c * tile_t + tile_t + 2, :]
         for c in range(num_chunks)],
        axis=1).reshape(B * num_chunks, tile_t + 2, D_in)

    # --- weights: conv split into its 3 taps (bf16); gloss+mapper fused and
    #     zero-padded to W lanes; translation head zero-padded to (W, W).
    w1_3 = w1.reshape(3, D_in, H).astype(jnp.bfloat16)
    b1 = params["b1"].astype(jnp.float32)

    wgm = jnp.zeros((H, W), jnp.float32)
    wgm = wgm.at[:, 0:Vg].set(params["wg"]).at[:, off_m:off_t].set(params["wm"])
    bgm = jnp.zeros((1, W), jnp.float32)
    bgm = bgm.at[:, 0:Vg].set(params["bg"]).at[:, off_m:off_t].set(params["bm"])
    wt_full = jnp.zeros((W, W), jnp.float32)
    wt_full = wt_full.at[off_m:off_t, off_t:off_t + Vt].set(params["wt"])
    bt_full = jnp.zeros((1, W), jnp.float32)
    bt_full = bt_full.at[:, off_t:off_t + Vt].set(params["bt"])
    wgm_bf = wgm.astype(jnp.bfloat16)
    wt_bf = wt_full.astype(jnp.bfloat16)

    rows = B * num_chunks * tile_t
    grid = (B * num_chunks,)

    # Advisory cost estimate so XLA schedules surrounding gather/mean ops well.
    flops = 2 * rows * (3 * D_in * H + H * W + W * W)
    transcendentals = 2 * rows * W
    bytes_accessed = (win.size * 4 + rows * W * 4
                      + (w1_3.size + wgm_bf.size + wt_bf.size) * 2
                      + (b1.size + bgm.size + bt_full.size) * 4)

    # Constant index maps -> weight blocks stay VMEM-resident across grid steps.
    full = lambda shp: pl.BlockSpec(shp, lambda i: (0,) * len(shp))

    kernel = functools.partial(_s2t_kernel, vg=Vg, td=Td, vt=Vt)

    slab = pl.pallas_call(
        kernel,
        out_shape=jax.ShapeDtypeStruct((rows, W), jnp.float32),
        grid_spec=pltpu.PrefetchScalarGridSpec(
            num_scalar_prefetch=0,
            grid=grid,
            in_specs=[
                pl.BlockSpec((1, tile_t + 2, D_in), lambda i: (i, 0, 0)),
                full((3, D_in, H)), full((1, H)),
                full((H, W)), full((1, W)),
                full((W, W)), full((1, W)),
            ],
            out_specs=pl.BlockSpec((tile_t, W), lambda i: (i, 0)),
        ),
        compiler_params=pltpu.CompilerParams(
            dimension_semantics=("parallel",)),   # shard grid across TCs (v7x)
        cost_estimate=pl.CostEstimate(
            flops=flops, transcendentals=transcendentals,
            bytes_accessed=bytes_accessed),
    )(win, w1_3, b1, wgm_bf, bgm, wt_bf, bt_full)

    slab = slab.reshape(B, T_pad, W)[:, :T, :]
    # NOTE: "gloss_logits" holds log-probabilities (post log-softmax), kept for
    # compatibility with the frame-level NLL stand-in below.
    gloss_logprobs = slab[..., 0:Vg]
    mapped_feature = slab[..., off_m:off_t]
    txt_logprobs = slab[..., off_t:off_t + Vt]

    # --- losses (glue: label gather + mean reductions)
    # TODO(synk): real RecognitionNetwork uses CTC loss + beam decoding and the
    # TranslationNetwork is an autoregressive mBART; frame-level NLL stand-in.
    rec_nll = -jnp.take_along_axis(
        gloss_logprobs, gloss_labels[..., None], axis=-1)[..., 0]
    recognition_loss = jnp.mean(rec_nll)

    trans_nll = -jnp.take_along_axis(
        txt_logprobs, txt_labels[..., None], axis=-1)[..., 0]
    translation_loss = jnp.mean(trans_nll)

    input_lengths = jnp.full((B,), T, dtype=jnp.int32)

    model_outputs = {
        "gloss_logits": gloss_logprobs,
        "mapped_feature": mapped_feature,
        "txt_logprobs": txt_logprobs,
        "input_lengths": input_lengths,
        "recognition_loss": recognition_loss,
        "translation_loss": translation_loss,
        "transformer_inputs": {"input_feature": mapped_feature,
                               "input_lengths": input_lengths},
    }
    model_outputs["total_loss"] = (model_outputs["recognition_loss"]
                                   + model_outputs["translation_loss"])
    return model_outputs


def init_params(key, *, d_in=16, hidden=32, vg=32, td=32, vt=64):
    ks = jax.random.split(key, 8)
    s = lambda fan_in: 1.0 / jnp.sqrt(jnp.float32(fan_in))
    return {
        "w1": jax.random.normal(ks[0], (3 * d_in, hidden), jnp.float32) * s(3 * d_in),
        "b1": jax.random.normal(ks[1], (1, hidden), jnp.float32) * 0.01,
        "wg": jax.random.normal(ks[2], (hidden, vg), jnp.float32) * s(hidden),
        "bg": jax.random.normal(ks[3], (1, vg), jnp.float32) * 0.01,
        "wm": jax.random.normal(ks[4], (hidden, td), jnp.float32) * s(hidden),
        "bm": jax.random.normal(ks[5], (1, td), jnp.float32) * 0.01,
        "wt": jax.random.normal(ks[6], (td, vt), jnp.float32) * s(td),
        "bt": jax.random.normal(ks[7], (1, vt), jnp.float32) * 0.01,
    }


if __name__ == "__main__":
    key = jax.random.PRNGKey(0)
    k_x, k_gl, k_tx, k_p = jax.random.split(key, 4)

    B, T, D_in = 2, 8, 16
    Vg, Vt = 32, 64

    params = init_params(k_p, d_in=D_in, hidden=32, vg=Vg, td=32, vt=Vt)

    src_input = {
        "sgn_features": jax.random.normal(k_x, (B, T, D_in), jnp.float32),
        "gloss_labels": jax.random.randint(k_gl, (B, T), 0, Vg, jnp.int32),
        "translation_inputs": {
            "labels": jax.random.randint(k_tx, (B, T), 0, Vt, jnp.int32),
        },
    }

    outputs = sign_language_model_forward(src_input, params)
    jax.block_until_ready(outputs["total_loss"])

    assert outputs["gloss_logits"].shape == (B, T, Vg)
    assert outputs["mapped_feature"].shape == (B, T, 32)
    assert outputs["txt_logprobs"].shape == (B, T, Vt)
    assert jnp.isfinite(outputs["total_loss"])
    print("KERNEL_OK")
</pallas_src>

<mosaic_0001>
module attributes {stable_mosaic.version = 11 : i64} {
  func.func @_s2t_kernel(%arg0: i32, %arg1: memref<1x10x16xf32, #tpu.memory_space<vmem>>, %arg2: memref<3x16x32xbf16, #tpu.memory_space<vmem>>, %arg3: memref<1x32xf32, #tpu.memory_space<vmem>>, %arg4: memref<32x128xbf16, #tpu.memory_space<vmem>>, %arg5: memref<1x128xf32, #tpu.memory_space<vmem>>, %arg6: memref<128x128xbf16, #tpu.memory_space<vmem>>, %arg7: memref<1x128xf32, #tpu.memory_space<vmem>>, %arg8: memref<8x128xf32, #tpu.memory_space<vmem>>) attributes {dimension_semantics = [#tpu.dimension_semantics<parallel>], iteration_bounds = array<i64: 2>, scalar_prefetch = 0 : i64, scratch_operands = 0 : i64, tpu.core_type = #tpu.core_type<tc>, window_params = [{transform_indices = @transform_0, window_bounds = array<i64: 1, 10, 16>}, {pipeline_mode = #tpu.pipeline_mode<synchronous>, transform_indices = @transform_1, window_bounds = array<i64: 3, 16, 32>}, {pipeline_mode = #tpu.pipeline_mode<synchronous>, transform_indices = @transform_2, window_bounds = array<i64: 1, 32>}, {pipeline_mode = #tpu.pipeline_mode<synchronous>, transform_indices = @transform_3, window_bounds = array<i64: 32, 128>}, {pipeline_mode = #tpu.pipeline_mode<synchronous>, transform_indices = @transform_4, window_bounds = array<i64: 1, 128>}, {pipeline_mode = #tpu.pipeline_mode<synchronous>, transform_indices = @transform_5, window_bounds = array<i64: 128, 128>}, {pipeline_mode = #tpu.pipeline_mode<synchronous>, transform_indices = @transform_6, window_bounds = array<i64: 1, 128>}, {transform_indices = @transform_7, window_bounds = array<i64: 8, 128>}]} {
    %c0 = arith.constant 0 : index
    %c0_0 = arith.constant 0 : index
    %c0_1 = arith.constant 0 : index
    %0 = vector.load %arg1[%c0, %c0_0, %c0_1] : memref<1x10x16xf32, #tpu.memory_space<vmem>>, vector<1x10x16xf32>
    %1 = vector.shape_cast %0 : vector<1x10x16xf32> to vector<10x16xf32>
    %2 = vector.extract_strided_slice %1 {offsets = [0, 0], sizes = [8, 16], strides = [1, 1]} : vector<10x16xf32> to vector<8x16xf32>
    %3 = arith.truncf %2 : vector<8x16xf32> to vector<8x16xbf16>
    %c0_2 = arith.constant 0 : index
    %c0_3 = arith.constant 0 : index
    %c0_4 = arith.constant 0 : index
    %4 = vector.load %arg2[%c0_2, %c0_3, %c0_4] : memref<3x16x32xbf16, #tpu.memory_space<vmem>>, vector<1x16x32xbf16>
    %5 = vector.shape_cast %4 : vector<1x16x32xbf16> to vector<16x32xbf16>
    %cst = arith.constant dense<0.000000e+00> : vector<8x32xf32>
    %6 = tpu.matmul %3, %5, %cst {dimension_numbers = #tpu.dot_dimension_numbers<[1], [0], [0], [1], [0, 0, 1, 1], [], []>} : vector<8x16xbf16>, vector<16x32xbf16>, vector<8x32xf32> -> vector<8x32xf32>
    %7 = vector.extract_strided_slice %1 {offsets = [1, 0], sizes = [8, 16], strides = [1, 1]} : vector<10x16xf32> to vector<8x16xf32>
    %8 = arith.truncf %7 : vector<8x16xf32> to vector<8x16xbf16>
    %c1 = arith.constant 1 : index
    %c0_5 = arith.constant 0 : index
    %c0_6 = arith.constant 0 : index
    %9 = vector.load %arg2[%c1, %c0_5, %c0_6] : memref<3x16x32xbf16, #tpu.memory_space<vmem>>, vector<1x16x32xbf16>
    %10 = vector.shape_cast %9 : vector<1x16x32xbf16> to vector<16x32xbf16>
    %cst_7 = arith.constant dense<0.000000e+00> : vector<8x32xf32>
    %11 = tpu.matmul %8, %10, %cst_7 {dimension_numbers = #tpu.dot_dimension_numbers<[1], [0], [0], [1], [0, 0, 1, 1], [], []>} : vector<8x16xbf16>, vector<16x32xbf16>, vector<8x32xf32> -> vector<8x32xf32>
    %12 = arith.addf %6, %11 : vector<8x32xf32>
    %13 = vector.extract_strided_slice %1 {offsets = [2, 0], sizes = [8, 16], strides = [1, 1]} : vector<10x16xf32> to vector<8x16xf32>
    %14 = arith.truncf %13 : vector<8x16xf32> to vector<8x16xbf16>
    %c2 = arith.constant 2 : index
    %c0_8 = arith.constant 0 : index
    %c0_9 = arith.constant 0 : index
    %15 = vector.load %arg2[%c2, %c0_8, %c0_9] : memref<3x16x32xbf16, #tpu.memory_space<vmem>>, vector<1x16x32xbf16>
    %16 = vector.shape_cast %15 : vector<1x16x32xbf16> to vector<16x32xbf16>
    %cst_10 = arith.constant dense<0.000000e+00> : vector<8x32xf32>
    %17 = tpu.matmul %14, %16, %cst_10 {dimension_numbers = #tpu.dot_dimension_numbers<[1], [0], [0], [1], [0, 0, 1, 1], [], []>} : vector<8x16xbf16>, vector<16x32xbf16>, vector<8x32xf32> -> vector<8x32xf32>
    %18 = arith.addf %12, %17 : vector<8x32xf32>
    %c0_11 = arith.constant 0 : index
    %c0_12 = arith.constant 0 : index
    %19 = vector.load %arg3[%c0_11, %c0_12] : memref<1x32xf32, #tpu.memory_space<vmem>>, vector<1x32xf32>
    %20 = vector.broadcast %19 : vector<1x32xf32> to vector<8x32xf32>
    %21 = arith.addf %18, %20 : vector<8x32xf32>
    %cst_13 = arith.constant 0.000000e+00 : f32
    %22 = vector.broadcast %cst_13 : f32 to vector<8x32xf32>
    %23 = arith.maximumf %21, %22 : vector<8x32xf32>
    %24 = arith.truncf %23 : vector<8x32xf32> to vector<8x32xbf16>
    %c0_14 = arith.constant 0 : index
    %c0_15 = arith.constant 0 : index
    %25 = vector.load %arg4[%c0_14, %c0_15] : memref<32x128xbf16, #tpu.memory_space<vmem>>, vector<32x128xbf16>
    %cst_16 = arith.constant dense<0.000000e+00> : vector<8x128xf32>
    %26 = tpu.matmul %24, %25, %cst_16 {dimension_numbers = #tpu.dot_dimension_numbers<[1], [0], [0], [1], [0, 0, 1, 1], [], []>} : vector<8x32xbf16>, vector<32x128xbf16>, vector<8x128xf32> -> vector<8x128xf32>
    %c0_17 = arith.constant 0 : index
    %c0_18 = arith.constant 0 : index
    %27 = vector.load %arg5[%c0_17, %c0_18] : memref<1x128xf32, #tpu.memory_space<vmem>>, vector<1x128xf32>
    %28 = vector.broadcast %27 : vector<1x128xf32> to vector<8x128xf32>
    %29 = arith.addf %26, %28 : vector<8x128xf32>
    %30 = tpu.iota {dimensions = array<i32: 1>} : vector<8x128xi32>
    %c32_i32 = arith.constant 32 : i32
    %31 = vector.broadcast %c32_i32 : i32 to vector<8x128xi32>
    %32 = arith.cmpi slt, %30, %31 : vector<8x128xi32>
    %cst_19 = arith.constant 0xFF800000 : f32
    %33 = vector.broadcast %cst_19 : f32 to vector<8x128xf32>
    %34 = arith.select %32, %29, %33 : vector<8x128xi1>, vector<8x128xf32>
    %cst_20 = arith.constant dense<0xFF800000> : vector<8xf32>
    %35 = vector.multi_reduction <maximumf>, %34, %cst_20 [1] : vector<8x128xf32> to vector<8xf32>
    %36 = vector.shape_cast %35 : vector<8xf32> to vector<8x1xf32>
    %37 = vector.broadcast %36 : vector<8x1xf32> to vector<8x128xf32>
    %38 = arith.subf %34, %37 : vector<8x128xf32>
    %39 = math.exp %38 : vector<8x128xf32>
    %cst_21 = arith.constant dense<0.000000e+00> : vector<8xf32>
    %40 = vector.multi_reduction <add>, %39, %cst_21 [1] : vector<8x128xf32> to vector<8xf32>
    %41 = vector.shape_cast %40 : vector<8xf32> to vector<8x1xf32>
    %42 = math.log %41 : vector<8x1xf32>
    %43 = arith.addf %36, %42 : vector<8x1xf32>
    %44 = vector.broadcast %43 : vector<8x1xf32> to vector<8x128xf32>
    %45 = arith.subf %29, %44 : vector<8x128xf32>
    %46 = arith.select %32, %45, %29 : vector<8x128xi1>, vector<8x128xf32>
    %47 = arith.truncf %29 : vector<8x128xf32> to vector<8x128xbf16>
    %c0_22 = arith.constant 0 : index
    %c0_23 = arith.constant 0 : index
    %48 = vector.load %arg6[%c0_22, %c0_23] : memref<128x128xbf16, #tpu.memory_space<vmem>>, vector<128x128xbf16>
    %cst_24 = arith.constant dense<0.000000e+00> : vector<8x128xf32>
    %49 = tpu.matmul %47, %48, %cst_24 {dimension_numbers = #tpu.dot_dimension_numbers<[1], [0], [0], [1], [0, 0, 1, 1], [], []>} : vector<8x128xbf16>, vector<128x128xbf16>, vector<8x128xf32> -> vector<8x128xf32>
    %c0_25 = arith.constant 0 : index
    %c0_26 = arith.constant 0 : index
    %50 = vector.load %arg7[%c0_25, %c0_26] : memref<1x128xf32, #tpu.memory_space<vmem>>, vector<1x128xf32>
    %51 = vector.broadcast %50 : vector<1x128xf32> to vector<8x128xf32>
    %52 = arith.addf %49, %51 : vector<8x128xf32>
    %c64_i32 = arith.constant 64 : i32
    %53 = vector.broadcast %c64_i32 : i32 to vector<8x128xi32>
    %54 = arith.cmpi sge, %30, %53 : vector<8x128xi32>
    %c128_i32 = arith.constant 128 : i32
    %55 = vector.broadcast %c128_i32 : i32 to vector<8x128xi32>
    %56 = arith.cmpi slt, %30, %55 : vector<8x128xi32>
    %57 = arith.andi %54, %56 : vector<8x128xi1>
    %cst_27 = arith.constant 0xFF800000 : f32
    %58 = vector.broadcast %cst_27 : f32 to vector<8x128xf32>
    %59 = arith.select %57, %52, %58 : vector<8x128xi1>, vector<8x128xf32>
    %cst_28 = arith.constant dense<0xFF800000> : vector<8xf32>
    %60 = vector.multi_reduction <maximumf>, %59, %cst_28 [1] : vector<8x128xf32> to vector<8xf32>
    %61 = vector.shape_cast %60 : vector<8xf32> to vector<8x1xf32>
    %62 = vector.broadcast %61 : vector<8x1xf32> to vector<8x128xf32>
    %63 = arith.subf %59, %62 : vector<8x128xf32>
    %64 = math.exp %63 : vector<8x128xf32>
    %cst_29 = arith.constant dense<0.000000e+00> : vector<8xf32>
    %65 = vector.multi_reduction <add>, %64, %cst_29 [1] : vector<8x128xf32> to vector<8xf32>
    %66 = vector.shape_cast %65 : vector<8xf32> to vector<8x1xf32>
    %67 = math.log %66 : vector<8x1xf32>
    %68 = arith.addf %61, %67 : vector<8x1xf32>
    %69 = vector.broadcast %68 : vector<8x1xf32> to vector<8x128xf32>
    %70 = arith.subf %52, %69 : vector<8x128xf32>
    %c64_i32_30 = arith.constant 64 : i32
    %71 = vector.broadcast %c64_i32_30 : i32 to vector<8x128xi32>
    %72 = arith.cmpi slt, %30, %71 : vector<8x128xi32>
    %73 = arith.select %72, %46, %70 : vector<8x128xi1>, vector<8x128xf32>
    %c0_31 = arith.constant 0 : index
    %c0_32 = arith.constant 0 : index
    %74 = vector.load %arg8[%c0_31, %c0_32] : memref<8x128xf32, #tpu.memory_space<vmem>>, vector<8x128xf32>
    tpu.vector_store %arg8[%c0_31, %c0_32], %73 {strides = array<i32>} : memref<8x128xf32, #tpu.memory_space<vmem>>, vector<8x128xf32>,
    return
  }
  func.func @transform_0(%arg0: i32) -> (i32, i32, i32) {
    %c0_i32 = arith.constant 0 : i32
    %c0_i32_0 = arith.constant 0 : i32
    %c0_i32_1 = arith.constant 0 : i32
    return %arg0, %c0_i32, %c0_i32_0 : i32, i32, i32
  }
  func.func @transform_1(%arg0: i32) -> (i32, i32, i32) {
    %c0_i32 = arith.constant 0 : i32
    %c0_i32_0 = arith.constant 0 : i32
    %c0_i32_1 = arith.constant 0 : i32
    %c0_i32_2 = arith.constant 0 : i32
    return %c0_i32, %c0_i32_0, %c0_i32_1 : i32, i32, i32
  }
  func.func @transform_2(%arg0: i32) -> (i32, i32) {
    %c0_i32 = arith.constant 0 : i32
    %c0_i32_0 = arith.constant 0 : i32
    %c0_i32_1 = arith.constant 0 : i32
    return %c0_i32, %c0_i32_0 : i32, i32
  }
  func.func @transform_3(%arg0: i32) -> (i32, i32) {
    %c0_i32 = arith.constant 0 : i32
    %c0_i32_0 = arith.constant 0 : i32
    %c0_i32_1 = arith.constant 0 : i32
    return %c0_i32, %c0_i32_0 : i32, i32
  }
  func.func @transform_4(%arg0: i32) -> (i32, i32) {
    %c0_i32 = arith.constant 0 : i32
    %c0_i32_0 = arith.constant 0 : i32
    %c0_i32_1 = arith.constant 0 : i32
    return %c0_i32, %c0_i32_0 : i32, i32
  }
  func.func @transform_5(%arg0: i32) -> (i32, i32) {
    %c0_i32 = arith.constant 0 : i32
    %c0_i32_0 = arith.constant 0 : i32
    %c0_i32_1 = arith.constant 0 : i32
    return %c0_i32, %c0_i32_0 : i32, i32
  }
  func.func @transform_6(%arg0: i32) -> (i32, i32) {
    %c0_i32 = arith.constant 0 : i32
    %c0_i32_0 = arith.constant 0 : i32
    %c0_i32_1 = arith.constant 0 : i32
    return %c0_i32, %c0_i32_0 : i32, i32
  }
  func.func @transform_7(%arg0: i32) -> (i32, i32) {
    %c0_i32 = arith.constant 0 : i32
    %c0_i32_0 = arith.constant 0 : i32
    return %arg0, %c0_i32 : i32, i32
  }
}

</mosaic_0001>

<bundles_post_ra>
// kernel: tpu_custom_call.1
= control target key start
LH: loop header
LB: loop body
LE: loop exit
PB: predicated region body
PF: predicated region fallthrough
CT: control target
= control target key end

     0   :  { %12 = vsyncpa [#allocation3], 0  ;;  %s1228_s0 = inlined_call_operand.vmem [shape: f32[2,10,16], index: 0, kind: input, shape index: {}]   ;;  %s1229_s1 = inlined_call_operand.vmem [shape: bf16[3,16,32], index: 1, kind: input, shape index: {}]   ;;  %s1230_s2 = inlined_call_operand.vmem [shape: f32[1,32], index: 2, kind: input, shape index: {}]   ;;  %s1231_s3 = inlined_call_operand.vmem [shape: bf16[32,128], index: 3, kind: input, shape index: {}]   ;;  %s1232_s4 = inlined_call_operand.vmem [shape: f32[1,128], index: 4, kind: input, shape index: {}]   ;;  %s1233_s5 = inlined_call_operand.hbm [shape: bf16[128,128], index: 5, kind: input, shape index: {}]   ;;  %s1234_s6 = inlined_call_operand.vmem [shape: f32[1,128], index: 6, kind: input, shape index: {}]   ;;  %s1235_s7 = inlined_call_operand.hbm [shape: f32[16,128], index: 7, kind: output, shape index: {}]  }
   0x1   :  { %13 = vsyncpa [#allocation4], 0 }
   0x2   :  { %15 = vsyncpa [#allocation4 + $0x1], 0  ;;  %s1086_s24 = smov 0   ;;  %s1088_s25 = smov 0  }
   0x3   :  { %s1090_s26 = smov 0   ;;  %s1092_s27 = smov 0  }
   0x4 LB: > { %s1107_s28 = sadd.s32 4294967295, %s1038_s27   ;;  %s771_s29 = sadd.s32 4294967294, %s1038_s27   ;;  %s1038_s27 = sphi %s1092_s27, %s1243_s27   ;;  %s1034_s26 = sphi %s1090_s26, %s1242_s26   ;;  %s1030_s25 = sphi %s1088_s25, %s1241_s25   ;;  %s1026_s24 = sphi %s1086_s24, %s1240_s24  }
   0x5   : > { %s1111_s30 = sadd.s32 1, %s1038_s27   ;;  %s180_s8 = sadd.s32 1, %s1034_s26 }
   0x6   : > { %s177_s9 = ssub.s32 %s1038_s27, %s1111_s30  ;;  %p190_p0 = scmp.ne.s32.totalorder %s1034_s26, %s1030_s25 }
   0x7   : > { %p178_p1 = scmp.eq.s32.totalorder %s177_s9, 0  ;;  %p191_p2 = scmp.eq.s32.totalorder %s1107_s28, 1 }
   0x8   : > { %p196_p3 = scmp.ne.s32.totalorder %s1030_s25, %s1026_s24  ;;  %p197_p4 = scmp.eq.s32.totalorder %s771_s29, 1 }
   0x9   : > { %s1122_s10 = scalar_select %p178_p1, %s1034_s26, %s180_s8  }
   0xa   : > { %p1124_p5 = por %p191_p2, %p190_p0  ;;  %p1128_p6 = por %p197_p4, %p196_p3 }
   0xb   : > { %p772_p7 = scmp.ge.s32.totalorder %s1038_s27, 1  ;;  %p204_p8 = scmp.lt.s32.totalorder %s1038_s27, 3 }
   0xc   : > { %s1237_s12 = scalar_select %p1128_p6, 1, 0 }
   0xd   : > { %p887_p9 = scmp.eq.s32.totalorder %s1107_s28, 0  ;;  %p1135_p10 = pnand %p772_p7, %p204_p8 }
   0xe   : > { %s1040_s14 = smov [#allocation2]  }
   0xf   : > { %s228_s15 = sshll.u32 %s1040_s14, 4  ;;  %p879_p11 = pneg %p1135_p10  ;;  %s229_s15 = int_to_ptr.vmem [resolvable:$true] %s228_s15 }
  0x10   : > { %s959_s16 = scalar_lea.vmem %s229_s15, 1024  ;;  %p967_p3 = scmp.lt.s32.totalorder %s229_s15, %s229_s15 }
  0x11   : > { %p880_p12 = pnand %p887_p9, %p879_p11  ;;  %p960_p0 = scmp.ne.s32.totalorder %s229_s15, %s959_s16 }
  0x12   : > { %p968_p4 = scmp.lt.s32.totalorder %s959_s16, %s959_s16 }
  0x13   : > { %p950_p13 = pneg %p880_p12 }
  0x14   : > { %p969_p6 = por %p968_p4, %p967_p3 }
  0x15   : > { %p962_p1 = pnand %p960_p0, %p950_p13 }
  0x17   : > { %p963_p2 = pneg %p962_p1 }
  0x19   : > { %p970_p7 = pnand %p969_p6, %p963_p2 }
  0x1b   : > { %973 = shalt.err (!%p970_p7)
}
  0x1c   : > { %s1041_s17 = smov 64   ;;  %s1042_s18 = smov 4  }
  0x1d   : > { %882 = dma.hbm_to_vmem [thread:$0]  (!%p880_p12), %s1233_s5, 1024, %s229_s15, [#allocation3], %s1041_s17, %s1041_s17, %s1042_s18  }
  0x1e   : > { %255 = sbr.rel (%p1135_p10) target bundleno = 989 (0x3dd), region = 48 }
  0x23   : > { %1017 = dma.done.wait (%p887_p9), [#allocation3], 1024  }
  0x24   : > { %1019 = vsyncadd (%p887_p9), [#allocation3], 4294966272  ;;  %p287_p8 = scmp.lt.s32.totalorder %s1107_s28, 1  ;;  %v1043_v0 = vmov 0.0   ;;  %vm1044_vm0 = vmmov 0   ;;  %v927_v1 = vld [vmem:[%s1229_s1 + $0x8] sm:$0xff]   ;;  %v540_v41 = vlaneseq }
  0x25   : > { %827 = vmatprep.subr.bf16.mxu1 %v1043_v0  ;;  %829 = vmatprep.mubr.msk.bf16.mxu1 %vm1044_vm0, %v1043_v0  ;;  %vm315_vm1 = vcmask 130048   ;;  %v928_v8 = vld [vmem:[%s1229_s1] sm:$0xff]   ;;  %v929_v11 = vld [vmem:[%s1229_s1 + $0x10] sm:$0xff]   ;;  %v930_v13 = vld [vmem:[%s1231_s3 + $0x8] sm:$0xff]   ;;  %vm496_vm2 = vcmask 261120   ;;  %s284_s14 = sand.u32 1, %s1030_s25  }
  0x26   : > { %s288_s21 = scalar_select %p287_p8, %s1107_s28, 1  ;;  %853 = vmatprep.subr.bf16.mxu0 %v1043_v0  ;;  %869 = vmatprep.mubr.msk.bf16.mxu0 %vm1044_vm0, %v1043_v0  ;;  %v931_v14 = vld [vmem:[%s1231_s3] sm:$0xff]   ;;  %v932_v15 = vld [vmem:[#allocation2 + $0x38] sm:$0xff]   ;;  %v933_v16 = vld [vmem:[#allocation2 + $0x30] sm:$0xff]   ;;  %v541_v42 = vand.u32 127, %v540_v41 }
  0x27   : > { %828 = vmatpush3.bf16.msra.mxu1 %v927_v1  ;;  %854 = vmatpush3.bf16.msra.mxu0 %v932_v15  ;;  %v934_v17 = vld [vmem:[#allocation2 + $0x28] sm:$0xff]   ;;  %v935_v18 = vld [vmem:[#allocation2 + $0x20] sm:$0xff]   ;;  %v936_v19 = vld [vmem:[#allocation2 + $0x18] sm:$0xff]   ;;  %s777_s15 = sshll.u32 %s284_s14, 3  ;;  %s805_s16 = sshll.u32 %s1107_s28, 7 }
  0x28   : > { %s808_s22 = sshll.u32 %s288_s21, 4  ;;  %833 = vmatprep.subr.bf16.mxu1 %v1043_v0  ;;  %855 = vmatprep.subr.bf16.mxu0 %v1043_v0  ;;  %v937_v20 = vld [vmem:[#allocation2 + $0x10] sm:$0xff]   ;;  %v938_v21 = vld [vmem:[#allocation2 + $0x8] sm:$0xff]   ;;  %v790_v32 = vld [vmem:[%s1230_s2] ss:$0 sm:$0xff]  ;;  %vm542_vm3 = vcmp.lt.s32.totalorder %v541_v42, 32  ;;  %s1193_s21 = scalar_lea.hbm %s1235_s7, %s805_s16 }
  0x29   : > { %s291_s8 = scalar_lea.vmem %s1228_s0, %s808_s22  ;;  %v939_v40 = vld [vmem:[#allocation2] sm:$0xff]   ;;  %vm668_vm4 = vcmp.ge.s32.totalorder %v541_v42, 64  ;;  %s286_s17 = scalar_lea.vmem [#allocation5], %s777_s15  ;;  %vm683_vm5 = vcmp.lt.s32.totalorder %v541_v42, 64 }
  0x2a   : > { %v293_v2 = vld [vmem:[%s291_s8] sm:$0xff]  ;;  %v294_v3 = vld [vmem:[%s291_s8 + $0x8] sm:$0x3]  ;;  %s700_s18 = sshll.u32 %s286_s17, 4  ;;  %s687_s22 = scalar_lea.sflag [#allocation4], %s284_s14  ;;  %s701_s18 = int_to_ptr.vmem [resolvable:$true] %s700_s18 }
  0x2b   : > { %v298_v4 = vpack.c.bf16 %v294_v3, %v293_v2  ;;  %v295_v10 = vpack.c.bf16 %v293_v2, %v293_v2  ;;  %856 = vmatpush3.bf16.msra.mxu0 %v933_v16  ;;  %v791_v43 = vld [vmem:[%s1232_s4] ss:$0 sm:$0xff]  ;;  %s974_s23 = scalar_lea.vmem %s701_s18, 128  ;;  %s1045_s28 = smov [#allocation5]  }
  0x2c   : > { %857 = vmatprep.subr.bf16.mxu0 %v1043_v0  ;;  %v795_v55 = vld [vmem:[%s1234_s6] ss:$0 sm:$0xff]  ;;  %p975_p6 = scmp.ne.s32.totalorder %s701_s18, %s974_s23  ;;  %s978_s29 = sshll.u32 %s1045_s28, 4  ;;  %s979_s29 = int_to_ptr.vmem [resolvable:$false] %s978_s29 }
  0x2d   : > { %v303_v5 = vshrl.u32 %v298_v4, 16  ;;  %v305_v6 = vshll.u32 %v298_v4, 16  ;;  %v412_v12 = vrot.slane %v298_v4, 1  ;;  %s980_s8 = scalar_lea.vmem %s979_s29, 256  ;;  %p981_p11 = scmp.lt.s32.totalorder %s701_s18, %s979_s29 }
  0x2e   : > { %p976_p9 = pnand %p975_p6, %p1124_p5  ;;  %p982_p12 = scmp.lt.s32.totalorder %s980_s8, %s974_s23 }
  0x2f   : > { %v307_v7 = vrot.slane %v305_v6, 1  ;;  %858 = vmatpush3.bf16.msra.mxu0 %v934_v17 }
  0x30   : > { %859 = vmatprep.subr.bf16.mxu0 %v1043_v0  ;;  %p977_p10 = pneg %p976_p9  ;;  %p983_p13 = por %p982_p12, %p981_p11 }
  0x31   : > { %v308_v9 = vor.u32 %v307_v7, %v303_v5 }
  0x32   : > { %p984_p0 = pnand %p983_p13, %p977_p10 }
  0x33   : > { %830 = vmatmul.mubr.msk.bf16.vlgmr.msra.gmra.mxu1 %vm315_vm1, %v308_v9  ;;  %860 = vmatpush3.bf16.msra.mxu0 %v935_v18 }
  0x34   : > { %834 = vmatpush3.bf16.msra.mxu1 %v928_v8  ;;  %835 = vmatprep.mubr.msk.bf16.mxu1 %vm1044_vm0, %v1043_v0 }
  0x35   : > { %839 = vmatprep.subr.bf16.mxu1 %v1043_v0  ;;  %861 = vmatprep.subr.bf16.mxu0 %v1043_v0 }
  0x37   : > { %862 = vmatpush3.bf16.msra.mxu0 %v936_v19 }
  0x38   : > { %863 = vmatprep.subr.bf16.mxu0 %v1043_v0 }
  0x3b   : > { %836 = vmatmul.mubr.msk.bf16.vlgmr.msra.gmra.mxu1 %vm315_vm1, %v295_v10  ;;  %864 = vmatpush3.bf16.msra.mxu0 %v937_v20 }
  0x3c   : > { %840 = vmatpush3.bf16.msra.mxu1 %v929_v11  ;;  %841 = vmatprep.mubr.msk.bf16.mxu1 %vm1044_vm0, %v1043_v0 }
  0x3d   : > { %845 = vmatprep.subr.bf16.mxu1 %v1043_v0  ;;  %865 = vmatprep.subr.bf16.mxu0 %v1043_v0 }
  0x3f   : > { %866 = vmatpush3.bf16.msra.mxu0 %v938_v21 }
  0x40   : > { %867 = vmatprep.subr.bf16.mxu0 %v1043_v0 }
  0x43   : > { %842 = vmatmul.mubr.msk.bf16.vlgmr.msra.gmra.mxu1 %vm315_vm1, %v412_v12  ;;  %868 = vmatpush3.bf16.msra.mxu0 %v939_v40 }
  0x44   : > { %849 = vmatprep.mubr.msk.bf16.mxu1 %vm1044_vm0, %v1043_v0  ;;  %846 = vmatpush3.bf16.msra.mxu1 %v930_v13 }
  0x45   : > { %847 = vmatprep.subr.bf16.mxu1 %v1043_v0 }
  0x48   : > { %848 = vmatpush3.bf16.msra.mxu1 %v931_v14 }
  0xf3   : > { %v353_v22 = vpop.f32.mrf.mxu1 }
  0xf5   : > { %v831_v23 = vpop.f32.mrf.mxu1 }
  0xf7   : > { %v356_v24 = vpop.f32.mrf.mxu1 }
  0xf9   : > { %v832_v25 = vpop.f32.mrf.mxu1 }
  0xfb   : > { %v402_v26 = vpop.f32.mrf.mxu1 }
  0xfc   : > { %v403_v30 = vadd.f32 %v402_v26, %v353_v22 }
  0xfd   : > { %v837_v27 = vpop.f32.mrf.mxu1 }
  0xff   : > { %v405_v28 = vpop.f32.mrf.mxu1 }
 0x101   : > { %v838_v29 = vpop.f32.mrf.mxu1 }
 0x103   : > { %v456_v31 = vpop.f32.mrf.mxu1 }
 0x104   : > { %v462_v33 = vadd.f32 %v456_v31, %v403_v30 }
 0x105   : > { %v843_v34 = vpop.f32.mrf.mxu1 }
 0x106   : > { %v470_v35 = vadd.f32 %v790_v32, %v462_v33 }
 0x107   : > { %v459_v36 = vpop.f32.mrf.mxu1 }
 0x108   : > { %v471_v37 = vmax.f32 %v470_v35, 0.0 }
 0x109   : > { %v844_v38 = vpop.f32.mrf.mxu1 }
 0x10a   : > { %v472_v39 = vpack.c.bf16 %v471_v37, %v471_v37 }
 0x10c   : > { %850 = vmatmul.mubr.msk.bf16.vlgmr.msra.gmra.mxu1 %vm496_vm2, %v472_v39 }
 0x1cc   : > { %v534_v44 = vpop.f32.mrf.mxu1 }
 0x1cd   : > { %v535_v45 = vadd.f32 %v791_v43, %v534_v44 }
 0x1ce   : > { %v851_v46 = vpop.f32.mrf.mxu1 }
 0x1cf   : > { %v543_v47 = vsel %vm542_vm3, %v535_v45, -inf  ;;  %v556_v48 = vpack.c.bf16 %v535_v45, %v535_v45 }
 0x1d0   : > { %544 = vmax.xlane.f32.xlu0 %v543_v47  ;;  %v537_v49 = vpop.f32.mrf.mxu1 }
 0x1d1   : > { %870 = vmatmul.mubr.bf16.vlgmr.msra.gmra.mxu0 %v556_v48 }
 0x1d2   : > { %v852_v50 = vpop.f32.mrf.mxu1 }
 0x259   : > { %v545_v51 = vpop.xlane.xlu0 %544 }
 0x25a   : > { %v546_v52 = vsub.f32 %v543_v47, %v545_v51 }
 0x25c   : > { %v547_v53 = vmul.f32 1.442695, %v546_v52 }
 0x25e   : > { %940 = vpow2.f32 %v547_v53 }
 0x26b   : > { %v941_v54 = vpop.eup %940 }
 0x26c   : > { %549 = vadd.xlane.f32.xlu1 %v941_v54 }
 0x291   : > { %v662_v56 = vpop.f32.mrf.mxu0 }
 0x292   : > { %v663_v57 = vadd.f32 %v795_v55, %v662_v56 }
 0x293   : > { %v871_v58 = vpop.f32.mrf.mxu0 }
 0x294   : > { %v671_v59 = vsel %vm668_vm4, %v663_v57, -inf }
 0x295   : > { %v665_v60 = vpop.f32.mrf.mxu0  ;;  %672 = vmax.xlane.f32.xlu0 %v671_v59 }
 0x297   : > { %v872_v61 = vpop.f32.mrf.mxu0 }
 0x2f5   : > { %v550_v2 = vpop.xlane.xlu1 %549 }
 0x31e   : > { %v673_v62 = vpop.xlane.xlu0 %672 }
 0x31f   : > { %v674_v63 = vsub.f32 %v671_v59, %v673_v62 }
 0x321   : > { %v675_v0 = vmul.f32 1.442695, %v674_v63 }
 0x323   : > { %942 = vpow2.f32 %v675_v0 }
 0x324   : > { %944 = vlog2.f32 %v550_v2 }
 0x330   : > { %v943_v1 = vpop.eup %942 }
 0x331   : > { %677 = vadd.xlane.f32.xlu1 %v943_v1  ;;  %v945_v4 = vpop.eup %944 }
 0x332   : > { %v552_v5 = vmul.f32 0.6931472, %v945_v4 }
 0x334   : > { %v553_v6 = vadd.f32 %v552_v5, %v545_v51 }
 0x336   : > { %v554_v9 = vsub.f32 %v535_v45, %v553_v6 }
 0x338   : > { %v555_v12 = vsel %vm542_vm3, %v554_v9, %v535_v45 }
 0x3ba   : > { %v678_v3 = vpop.xlane.xlu1 %677 }
 0x3bb   : > { %946 = vlog2.f32 %v678_v3 }
 0x3c8   : > { %v947_v7 = vpop.eup %946 }
 0x3c9   : > { %v680_v8 = vmul.f32 0.6931472, %v947_v7 }
 0x3cb   : > { %v681_v10 = vadd.f32 %v680_v8, %v673_v62 }
 0x3cd   : > { %v682_v11 = vsub.f32 %v663_v57, %v681_v10 }
 0x3cf   : > { %v684_v13 = vsel %vm683_vm5, %v555_v12, %v682_v11 }
 0x3d0   : > { %685 = vst [vmem:[%s286_s17] sm:$0xff] %v684_v13 }
 0x3d1   : > { %987 = shalt.err (!%p984_p0)
}
 0x3d2   : > { %s988_s9 = scalar_lea.hbm %s1193_s21, 128  ;;  %s992_s15 = scalar_lea.hbm %s1235_s7, 256 }
 0x3d3   : > { %p989_p1 = scmp.ne.s32.totalorder %s1193_s21, %s988_s9  ;;  %p993_p4 = scmp.lt.s32.totalorder %s1193_s21, %s1235_s7 }
 0x3d4   : > { %p994_p7 = scmp.lt.s32.totalorder %s992_s15, %s988_s9 }
 0x3d5   : > { %p990_p2 = pnand %p989_p1, %p1124_p5 }
 0x3d6   : > { %p995_p8 = por %p994_p7, %p993_p4 }
 0x3d7   : > { %p991_p3 = pneg %p990_p2 }
 0x3d9   : > { %p996_p6 = pnand %p995_p8, %p991_p3 }
 0x3db   : > { %999 = shalt.err (!%p996_p6)
}
 0x3dc   : > { %877 = dma.vmem_to_hbm [thread:$0]  (%p1124_p5), %s701_s18, 128, %s1193_s21, %s687_s22  }
 0x3dd PF: > { %p889_p9 = scmp.ge.s32.totalorder %s1038_s27, 2  ;;  %s712_s19 = sand.u32 1, %s1026_s24  }
 0x3de   : > { %p1239_p10 = scmp.ne.s32.totalorder %s1237_s12, 0  ;;  %s713_s20 = scalar_lea.sflag [#allocation4], %s712_s19 }
 0x3e0   : > { %p884_p11 = pnand %p889_p9, %p1239_p10 }
 0x3e2   : > { %p885_p12 = pneg %p884_p11 }
 0x3e4   : > { %1021 = dma.done.wait (%p885_p12), %s713_s20, 128  }
 0x3e5   : > { %1023 = vsyncadd (%p885_p12), %s713_s20, 4294967168  ;;  %p18_p13 = scmp.ge.s32.totalorder %s1111_s30, 4   ;;  %s1240_s24 = smov %s1030_s25 }
 0x3e6   : > { %s1241_s25 = smov %s1034_s26  ;;  %s1242_s26 = smov %s1122_s10 }
 0x3e7   : > { %s1243_s27 = smov %s1111_s30  ;;  %20 = sbr.rel (!%p18_p13) target bundleno = 4 (0x4), region = 90 }
 0x3ec   :  { %718 = vsyncpa [#allocation3], 1 }
 0x3ed   :  { %720 = vsyncpa [#allocation3 + $0x1], 1 }
 0x3ee   :  { %721 = vsyncpa [#allocation4], 1 }
 0x3ef   :  { %723 = vsyncpa [#allocation4 + $0x1], 1 }

</bundles_post_ra>
